<compile_context>
chip_gen: v7x
topology: tpu7x:2x2x1
jax: 0.10.0
libtpu: 0.0.40
codegen_flags: <defaults>
</compile_context>

<pallas_src>
import functools

import jax
import jax.numpy as jnp
from jax.experimental import pallas as pl
from jax.experimental.pallas import tpu as pltpu


def _gem_kernel(p_ref, x_ref, o_ref, acc_ref, *, eps, true_s, ts, s_grid_axis):
    """Shared GeM body.

    p_ref : SMEM (1,) f32        -- trainable exponent p
    x_ref : VMEM block; the spatial (reduction) extent is block axis 1
            layout A: (TR, TS)       (rows on sublanes, spatial on lanes)
            layout B: (1, TS, TC)    (spatial on sublanes, channels on lanes)
    o_ref : VMEM block matching acc_ref shape (spatial axis collapsed to 1)
    acc_ref: f32 VMEM scratch running sum, same shape as o_ref
    """
    k = pl.program_id(s_grid_axis)
    nk = pl.num_programs(s_grid_axis)

    @pl.when(k == 0)
    def _():
        acc_ref[...] = jnp.zeros_like(acc_ref)

    p = p_ref[0]
    x = x_ref[...]
    # clamp(min=eps) then x**p ; x > 0 after clamp so pow == exp(p * log(x)).
    # Keep the transcendentals in the input dtype (bf16 EUP on v6e/v7x).
    xc = jnp.maximum(x, jnp.asarray(eps, x.dtype))
    xp = jnp.exp(p.astype(xc.dtype) * jnp.log(xc)).astype(jnp.float32)

    # Mask padded spatial positions of a ragged last tile (they hold garbage
    # loads -> possibly NaN; select 0 so they never touch the running sum).
    if true_s % ts != 0:
        idx = jax.lax.broadcasted_iota(jnp.int32, xp.shape, 1) + k * ts
        xp = jnp.where(idx < true_s, xp, 0.0)

    acc_ref[...] += jnp.sum(xp, axis=1, keepdims=True)

    @pl.when(k == nk - 1)
    def _():
        inv_p = 1.0 / p                      # hoisted: one scalar divide
        mean = acc_ref[...] * (1.0 / true_s)  # divide by the TRUE H*W
        o_ref[...] = jnp.exp(jnp.log(mean) * inv_p).astype(o_ref.dtype)


def _round_up(a, b):
    return -(-a // b) * b


_BLOCK_BYTES = 2 * 1024 * 1024       # per-input-block budget (x2 double buffer)
_VMEM_LIMIT = 32 * 1024 * 1024       # safe on v5e (128 MiB phys) and v7x (64 MiB)


def gem_pallas(x, p, eps=1e-6):
    """x: (N, C, H, W) float array; p: (1,)/scalar float. Returns (N, C, 1, 1)."""
    N, C, H, W = x.shape
    S = H * W
    p_arr = jnp.asarray(p, jnp.float32).reshape((1,))
    itemsize = jnp.dtype(x.dtype).itemsize

    # Lane-density heuristic: prefer the zero-copy (N*C, H*W) layout unless the
    # spatial extent wastes most of each vreg AND channels would fill lanes
    # (the extra NCHW->NHWC transpose pass must be worth the EUP savings).
    s_util = S / _round_up(S, 128)
    c_util = C / _round_up(C, 128)
    use_channels_on_lanes = (c_util > 1.5 * s_util) and (C >= 128)

    if not use_channels_on_lanes:
        # ---------- layout A: (R = N*C, S), reduce over the lane axis ----------
        R = N * C
        x2 = x.reshape(R, S)

        TS = S if S <= 2048 else 2048                      # 2048 % 128 == 0
        lane_bytes = _round_up(TS, 128) * itemsize
        TR = max(8, min(_BLOCK_BYTES // lane_bytes, 4096) // 8 * 8)
        if TR >= R:
            TR = R                                          # full extent is allowed

        grid = (pl.cdiv(R, TR), pl.cdiv(S, TS))
        kernel = functools.partial(
            _gem_kernel, eps=eps, true_s=S, ts=TS, s_grid_axis=1)

        out2d = pl.pallas_call(
            kernel,
            out_shape=jax.ShapeDtypeStruct((R, 1), x.dtype),
            grid=grid,
            in_specs=[
                pl.BlockSpec(memory_space=pltpu.SMEM),               # p
                pl.BlockSpec((TR, TS), lambda i, k: (i, k)),         # x tile
            ],
            out_specs=pl.BlockSpec((TR, 1), lambda i, k: (i, 0)),
            scratch_shapes=[pltpu.VMEM((TR, 1), jnp.float32)],
            compiler_params=pltpu.CompilerParams(
                dimension_semantics=("parallel", "arbitrary"),
                vmem_limit_bytes=_VMEM_LIMIT),
            cost_estimate=pl.CostEstimate(
                flops=3 * R * S,
                transcendentals=2 * R * S,
                bytes_accessed=R * S * itemsize + R * itemsize),
        )(p_arr, x2)
        return out2d.reshape(N, C, 1, 1)

    # ---------- layout B: (N, S, C), channels on lanes, reduce over S ----------
    xb = jnp.transpose(x, (0, 2, 3, 1)).reshape(N, S, C)

    TC = C if C <= 2048 else 2048                           # 2048 % 128 == 0
    lane_bytes = _round_up(TC, 128) * itemsize
    TS = max(8, min(_BLOCK_BYTES // lane_bytes, 1024) // 8 * 8)
    if TS >= S:
        TS = S                                              # full extent is allowed

    grid = (N, pl.cdiv(C, TC), pl.cdiv(S, TS))
    kernel = functools.partial(
        _gem_kernel, eps=eps, true_s=S, ts=TS, s_grid_axis=2)

    out3d = pl.pallas_call(
        kernel,
        out_shape=jax.ShapeDtypeStruct((N, 1, C), x.dtype),
        grid=grid,
        in_specs=[
            pl.BlockSpec(memory_space=pltpu.SMEM),                       # p
            pl.BlockSpec((1, TS, TC), lambda n, c, k: (n, k, c)),        # x tile
        ],
        out_specs=pl.BlockSpec((1, 1, TC), lambda n, c, k: (n, 0, c)),   # lane-dense
        scratch_shapes=[pltpu.VMEM((1, 1, TC), jnp.float32)],
        compiler_params=pltpu.CompilerParams(
            dimension_semantics=("parallel", "parallel", "arbitrary"),
            vmem_limit_bytes=_VMEM_LIMIT),
        cost_estimate=pl.CostEstimate(
            flops=3 * N * C * S,
            transcendentals=2 * N * C * S,
            bytes_accessed=N * C * S * itemsize + N * C * itemsize),
    )(p_arr, xb)
    return out3d.reshape(N, C, 1, 1)


def gem_reference(x, p, eps=1e-6):
    """Pure-JAX reference matching the PyTorch gem()."""
    p = jnp.asarray(p, jnp.float32).reshape(())
    xc = jnp.maximum(x.astype(jnp.float32), eps)
    xp = xc ** p
    return jnp.mean(xp, axis=(-2, -1), keepdims=True) ** (1.0 / p)


if __name__ == "__main__":
    key = jax.random.PRNGKey(0)
    k1, k2 = jax.random.split(key)
    eps = 1e-6
    # Deterministic parameter init, as in GeM.__init__: p = ones(1) * 3
    p = jnp.ones((1,), dtype=jnp.float32) * 3.0

    # Test 1: lane-dense spatial extent (16x16 = 256 lanes) -> (N*C, H*W) path.
    x1 = jax.random.normal(k1, (2, 4, 16, 16), dtype=jnp.float32)
    out1 = jax.block_until_ready(gem_pallas(x1, p, eps))
    ref1 = gem_reference(x1, p, eps)
    assert out1.shape == (2, 4, 1, 1), out1.shape
    assert jnp.allclose(out1, ref1, rtol=1e-4, atol=1e-5), (
        float(jnp.max(jnp.abs(out1 - ref1))))

    # Test 2: tiny spatial extent (7x7 = 49) with many channels ->
    # channels-on-lanes path (EUP lane-density optimization).
    x2 = jax.random.normal(k2, (2, 256, 7, 7), dtype=jnp.float32)
    out2 = jax.block_until_ready(gem_pallas(x2, p, eps))
    ref2 = gem_reference(x2, p, eps)
    assert out2.shape == (2, 256, 1, 1), out2.shape
    assert jnp.allclose(out2, ref2, rtol=1e-4, atol=1e-5), (
        float(jnp.max(jnp.abs(out2 - ref2))))

    print("KERNEL_OK")
</pallas_src>

<mosaic_0001>
module attributes {stable_mosaic.version = 11 : i64} {
  func.func @_gem_kernel(%arg0: i32, %arg1: i32, %arg2: memref<1xf32, #tpu.memory_space<smem>>, %arg3: memref<8x256xf32, #tpu.memory_space<vmem>>, %arg4: memref<8x1xf32, #tpu.memory_space<vmem>>, %arg5: memref<8x1xf32, #tpu.memory_space<vmem>>) attributes {dimension_semantics = [#tpu.dimension_semantics<parallel>, #tpu.dimension_semantics<arbitrary>], iteration_bounds = array<i64: 1, 1>, scalar_prefetch = 0 : i64, scratch_operands = 1 : i64, tpu.core_type = #tpu.core_type<tc>, window_params = [{transform_indices = @transform_0, window_bounds = array<i64: 1>}, {transform_indices = @transform_1, window_bounds = array<i64: 8, 256>}, {transform_indices = @transform_2, window_bounds = array<i64: 8, 1>}]} {
    %c0_i32 = arith.constant 0 : i32
    %0 = arith.cmpi eq, %arg1, %c0_i32 : i32
    %1 = arith.extui %0 : i1 to i32
    %c0_i32_0 = arith.constant 0 : i32
    %2 = arith.cmpi ne, %1, %c0_i32_0 : i32
    scf.if %2 {
      %cst_10 = arith.constant 0.000000e+00 : f32
      %19 = vector.broadcast %cst_10 : f32 to vector<8x1xf32>
      %c0_11 = arith.constant 0 : index
      %c0_12 = arith.constant 0 : index
      %20 = vector.load %arg5[%c0_11, %c0_12] : memref<8x1xf32, #tpu.memory_space<vmem>>, vector<8x1xf32>
      tpu.vector_store %arg5[%c0_11, %c0_12], %19 {strides = array<i32>} : memref<8x1xf32, #tpu.memory_space<vmem>>, vector<8x1xf32>,
    } else {
    }
    %c0 = arith.constant 0 : index
    %3 = memref.load %arg2[%c0] : memref<1xf32, #tpu.memory_space<smem>>
    %c0_1 = arith.constant 0 : index
    %c0_2 = arith.constant 0 : index
    %4 = vector.load %arg3[%c0_1, %c0_2] : memref<8x256xf32, #tpu.memory_space<vmem>>, vector<8x256xf32>
    %cst = arith.constant 9.99999997E-7 : f32
    %5 = vector.broadcast %cst : f32 to vector<8x256xf32>
    %6 = arith.maximumf %4, %5 : vector<8x256xf32>
    %7 = math.log %6 : vector<8x256xf32>
    %8 = vector.broadcast %3 : f32 to vector<8x256xf32>
    %9 = arith.mulf %8, %7 : vector<8x256xf32>
    %10 = math.exp %9 : vector<8x256xf32>
    %c0_3 = arith.constant 0 : index
    %c0_4 = arith.constant 0 : index
    %11 = vector.load %arg5[%c0_3, %c0_4] : memref<8x1xf32, #tpu.memory_space<vmem>>, vector<8x1xf32>
    %cst_5 = arith.constant dense<0.000000e+00> : vector<8xf32>
    %12 = vector.multi_reduction <add>, %10, %cst_5 [1] : vector<8x256xf32> to vector<8xf32>
    %13 = vector.shape_cast %12 : vector<8xf32> to vector<8x1xf32>
    %14 = arith.addf %11, %13 : vector<8x1xf32>
    %c0_6 = arith.constant 0 : index
    %c0_7 = arith.constant 0 : index
    %15 = vector.load %arg5[%c0_6, %c0_7] : memref<8x1xf32, #tpu.memory_space<vmem>>, vector<8x1xf32>
    tpu.vector_store %arg5[%c0_6, %c0_7], %14 {strides = array<i32>} : memref<8x1xf32, #tpu.memory_space<vmem>>, vector<8x1xf32>,
    %c0_i32_8 = arith.constant 0 : i32
    %16 = arith.cmpi eq, %arg1, %c0_i32_8 : i32
    %17 = arith.extui %16 : i1 to i32
    %c0_i32_9 = arith.constant 0 : i32
    %18 = arith.cmpi ne, %17, %c0_i32_9 : i32
    scf.if %18 {
      %cst_10 = arith.constant 1.000000e+00 : f32
      %19 = arith.divf %cst_10, %3 : f32
      %c0_11 = arith.constant 0 : index
      %c0_12 = arith.constant 0 : index
      %20 = vector.load %arg5[%c0_11, %c0_12] : memref<8x1xf32, #tpu.memory_space<vmem>>, vector<8x1xf32>
      %cst_13 = arith.constant 3.906250e-03 : f32
      %21 = vector.broadcast %cst_13 : f32 to vector<8x1xf32>
      %22 = arith.mulf %20, %21 : vector<8x1xf32>
      %23 = math.log %22 : vector<8x1xf32>
      %24 = vector.broadcast %19 : f32 to vector<8x1xf32>
      %25 = arith.mulf %23, %24 : vector<8x1xf32>
      %26 = math.exp %25 : vector<8x1xf32>
      %c0_14 = arith.constant 0 : index
      %c0_15 = arith.constant 0 : index
      %27 = vector.load %arg4[%c0_14, %c0_15] : memref<8x1xf32, #tpu.memory_space<vmem>>, vector<8x1xf32>
      tpu.vector_store %arg4[%c0_14, %c0_15], %26 {strides = array<i32>} : memref<8x1xf32, #tpu.memory_space<vmem>>, vector<8x1xf32>,
    } else {
    }
    return
  }
  func.func @transform_0(%arg0: i32, %arg1: i32) -> i32 {
    %c0_i32 = arith.constant 0 : i32
    %c0_i32_0 = arith.constant 0 : i32
    return %c0_i32 : i32
  }
  func.func @transform_1(%arg0: i32, %arg1: i32) -> (i32, i32) {
    %c0_i32 = arith.constant 0 : i32
    return %arg0, %arg1 : i32, i32
  }
  func.func @transform_2(%arg0: i32, %arg1: i32) -> (i32, i32) {
    %c0_i32 = arith.constant 0 : i32
    %c0_i32_0 = arith.constant 0 : i32
    return %arg0, %c0_i32 : i32, i32
  }
}

</mosaic_0001>

<bundles_post_ra>
// kernel: tpu_custom_call.1
= control target key start
LH: loop header
LB: loop body
LE: loop exit
PB: predicated region body
PF: predicated region fallthrough
CT: control target
= control target key end

     0   :  { %8 = vsyncpa [#allocation5], 0  ;;  %s115_s9 = smov [#allocation4]   ;;  %s153_s0 = inlined_call_operand.<no memory space> [shape: f32[1], index: 0, kind: input, shape index: {}]   ;;  %s154_s1 = inlined_call_operand.hbm [shape: f32[8,256], index: 1, kind: input, shape index: {}]   ;;  %s155_s2 = inlined_call_operand.vmem [shape: f32[8,1], index: 2, kind: output, shape index: {}]  }
   0x1   :  { %s17_s10 = sshll.u32 %s115_s9, 4  ;;  %s91_s13 = scalar_lea.hbm %s154_s1, 256  ;;  %s18_s10 = int_to_ptr.vmem [resolvable:$true] %s17_s10 }
   0x2   :  { %p92_p0 = scmp.ne.s32.totalorder %s154_s1, %s91_s13  ;;  %p95_p1 = scmp.lt.u32.totalorder %s91_s13, %s154_s1 }
   0x4   :  { %p97_p2 = pnand %p95_p1, %p92_p0 }
   0x6   :  { %100 = shalt.err (!%p97_p2)
}
   0x7   :  { %s101_s18 = scalar_lea.vmem %s18_s10, 256  ;;  %p106_p4 = scmp.lt.s32.totalorder %s18_s10, %s18_s10 }
   0x8   :  { %p102_p3 = scmp.ne.s32.totalorder %s18_s10, %s101_s18  ;;  %p107_p5 = scmp.lt.s32.totalorder %s101_s18, %s101_s18 }
   0xa   :  { %p108_p6 = por %p107_p5, %p106_p4 }
   0xc   :  { %p109_p7 = pnand %p108_p6, %p102_p3 }
   0xe   :  { %112 = shalt.err (!%p109_p7)
}
   0xf   :  { %20 = dma.hbm_to_vmem [thread:$0]  %s154_s1, 256, %s18_s10, [#allocation5]  }
  0x10   :  { %113 = dma.done.wait [#allocation5], 256  }
  0x11   :  { %114 = vsyncadd [#allocation5], 4294967040  ;;  %vm28_vm0 = vcmask 7168   ;;  %v39_v0 = vstv %s153_s0  ;;  %v116_v1 = vmov 0.0   ;;  %v31_v2 = vld [vmem:[#allocation4] sm:$0xff]  ;;  %v32_v3 = vld [vmem:[#allocation4 + $0x8] sm:$0xff] }
  0x12   :  { %29 = vst.msk [vmem:[#allocation2] sm:$0xff] %vm28_vm0, %v116_v1  ;;  %77 = vrcp.f32 %v39_v0  ;;  %v33_v4 = vmax.f32 %v31_v2, 1e-06  ;;  %v34_v5 = vmax.f32 %v32_v3, 1e-06 }
  0x14   :  { %79 = vlog2.f32 %v33_v4 }
  0x15   :  { %81 = vlog2.f32 %v34_v5 }
  0x19   :  { %v46_v18 = vld [vmem:[#allocation2] sm:$0xff] }
  0x1c   :  { %v78_v6 = vpop.eup %77 }
  0x1d   :  { %73 = vpush %v78_v6 }
  0x1e   :  { %v80_v7 = vpop.eup %79 }
  0x1f   :  { %v82_v8 = vpop.eup %81  ;;  %v36_v9 = vmul.f32 0.6931472, %v80_v7 }
  0x20   :  { %v38_v10 = vmul.f32 0.6931472, %v82_v8 }
  0x21   :  { %v40_v11 = vmul.f32 %v39_v0, %v36_v9 }
  0x22   :  { %v41_v12 = vmul.f32 %v39_v0, %v38_v10 }
  0x23   :  { %v42_v13 = vmul.f32 1.442695, %v40_v11 }
  0x24   :  { %v44_v14 = vmul.f32 1.442695, %v41_v12 }
  0x25   :  { %83 = vpow2.f32 %v42_v13 }
  0x26   :  { %85 = vpow2.f32 %v44_v14 }
  0x2f   :  { %v84_v15 = vpop.eup %83 }
  0x30   :  { %v86_v16 = vpop.eup %85 }
  0x31   :  { %v47_v17 = vadd.f32 %v86_v16, %v84_v15 }
  0x33   :  { %48 = vadd.xlane.f32.xlu0 %v47_v17 }
  0x4e   :  { %s74_s0 = spop %73 }
  0x4f   :  { %v63_v24 = vstv %s74_s0 }
  0xc0   :  { %v49_v19 = vpop.xlane.xlu0 %48 }
  0xc1   :  { %v50_v20 = vadd.f32 %v49_v19, %v46_v18 }
  0xc3   :  { %52 = vst.msk [vmem:[#allocation2] sm:$0xff] %vm28_vm0, %v50_v20 }
  0xca   :  { %v59_v21 = vld [vmem:[#allocation2] sm:$0xff] }
  0xcb   :  { %v60_v22 = vmul.f32 0.00390625, %v59_v21 }
  0xcd   :  { %87 = vlog2.f32 %v60_v22 }
  0xd7   :  { %v88_v23 = vpop.eup %87 }
  0xd8   :  { %v62_v25 = vmul.f32 0.6931472, %v88_v23 }
  0xda   :  { %v64_v26 = vmul.f32 %v63_v24, %v62_v25 }
  0xdc   :  { %v65_v27 = vmul.f32 1.442695, %v64_v26 }
  0xde   :  { %89 = vpow2.f32 %v65_v27 }
  0xe8   :  { %v90_v28 = vpop.eup %89 }
  0xe9   :  { %67 = vst.msk [vmem:[%s155_s2] sm:$0xff] %vm28_vm0, %v90_v28 }
  0xea   :  { %72 = vsyncpa [#allocation5], 1 }

</bundles_post_ra>
